<compile_context>
chip_gen: v7x
topology: tpu7x:2x2x1
jax: 0.10.0
libtpu: 0.0.40
codegen_flags: <defaults>
</compile_context>

<pallas_src>
import functools

import jax
import jax.numpy as jnp
from jax import lax
from jax.experimental import pallas as pl
from jax.experimental.pallas import tpu as pltpu


def _encoder_layer_kernel(n_head, d_k,
                          xq_ref, xkv_ref,
                          wq_ref, wk_ref, wv_ref, wo_ref,
                          ln1_g_ref, ln1_b_ref,
                          w1_ref, b1_ref, w2_ref, b2_ref,
                          ln2_g_ref, ln2_b_ref,
                          out_ref, attn_ref,
                          acc_ref):
    h = pl.program_id(2)

    x_q = xq_ref[0]                     # (TQ, D) f32 -- query tile + residual
    x_kv = xkv_ref[0]                   # (L,  D) f32 -- full sequence for K/V

    xq_bf = x_q.astype(jnp.bfloat16)
    xkv_bf = x_kv.astype(jnp.bfloat16)

    # Per-head projections; weights arrive as pre-sliced per-head slabs
    # (bf16) via the BlockSpec index_map -> no lane slicing in-kernel.
    q = jnp.dot(xq_bf, wq_ref[0], preferred_element_type=jnp.float32)    # (TQ, dk)
    k = jnp.dot(xkv_bf, wk_ref[0], preferred_element_type=jnp.float32)   # (L, dk)
    v = jnp.dot(xkv_bf, wv_ref[0], preferred_element_type=jnp.float32)   # (L, dv)

    inv_temp = 1.0 / (d_k ** 0.5)
    q_scaled = (q * inv_temp).astype(jnp.bfloat16)

    # Scores: contract over d_k without an explicit in-kernel transpose.
    s = lax.dot_general(q_scaled, k.astype(jnp.bfloat16),
                        (((1,), (1,)), ((), ())),
                        preferred_element_type=jnp.float32)              # (TQ, L)

    # Numerically-stable softmax; reciprocal goes to the EUP (free slot).
    s = s - jnp.max(s, axis=-1, keepdims=True)
    e = jnp.exp(s)
    denom = jnp.sum(e, axis=-1, keepdims=True)
    p = e * pl.reciprocal(denom, approx=True)
    attn_ref[0, 0] = p                                                   # (TQ, L)

    head_out = jnp.dot(p.astype(jnp.bfloat16), v.astype(jnp.bfloat16),
                       preferred_element_type=jnp.float32)               # (TQ, dv)
    # Accumulate this head's contribution through its Wo slab directly into
    # the (TQ, D) accumulator (no lane-axis concat of head outputs).
    partial = jnp.dot(head_out.astype(jnp.bfloat16), wo_ref[0],
                      preferred_element_type=jnp.float32)                # (TQ, D)

    @pl.when(h == 0)
    def _():
        acc_ref[...] = jnp.zeros_like(acc_ref)

    acc_ref[...] += partial

    # Finalize: residual + LN1, FFN, residual + LN2 (only after the last head).
    @pl.when(h == n_head - 1)
    def _():
        mha = acc_ref[...]
        res1 = mha + x_q
        mu1 = jnp.mean(res1, axis=-1, keepdims=True)
        var1 = jnp.mean((res1 - mu1) ** 2, axis=-1, keepdims=True)
        x1 = (res1 - mu1) * lax.rsqrt(var1 + 1e-6) * ln1_g_ref[0] + ln1_b_ref[0]

        h1 = jnp.dot(x1.astype(jnp.bfloat16), w1_ref[...],
                     preferred_element_type=jnp.float32) + b1_ref[0]
        h1 = jnp.maximum(h1, 0.0)
        ff = jnp.dot(h1.astype(jnp.bfloat16), w2_ref[...],
                     preferred_element_type=jnp.float32) + b2_ref[0]

        res2 = ff + x1
        mu2 = jnp.mean(res2, axis=-1, keepdims=True)
        var2 = jnp.mean((res2 - mu2) ** 2, axis=-1, keepdims=True)
        out_ref[0] = ((res2 - mu2) * lax.rsqrt(var2 + 1e-6)
                      * ln2_g_ref[0] + ln2_b_ref[0])


def encoder_layer(x, params, *, n_head, d_k, d_v, block_q=None):
    """x: (B, L, D) float32.  Returns (enc_output (B,L,D), attn (B,H,L,L))."""
    B, L, D = x.shape
    d_inner = params["w1"].shape[1]

    # Query-tile size: multiple of 8 (or the whole sequence) to satisfy the
    # (8, 128) tiling constraint; bounds VMEM per grid step for long L.
    if block_q is None:
        block_q = 128 if (L % 128 == 0) else L
    assert L % block_q == 0
    n_qt = L // block_q

    # Host-side layout plumbing: per-head weight slabs so the pipeline DMAs
    # exactly one head's weights per grid step; bf16 weights for the MXU
    # (accumulation stays in f32 inside the kernel).
    wq = params["wq"].reshape(D, n_head, d_k).transpose(1, 0, 2).astype(jnp.bfloat16)
    wk = params["wk"].reshape(D, n_head, d_k).transpose(1, 0, 2).astype(jnp.bfloat16)
    wv = params["wv"].reshape(D, n_head, d_v).transpose(1, 0, 2).astype(jnp.bfloat16)
    wo = params["wo"].reshape(n_head, d_v, D).astype(jnp.bfloat16)
    w1 = params["w1"].astype(jnp.bfloat16)
    w2 = params["w2"].astype(jnp.bfloat16)

    kernel = functools.partial(_encoder_layer_kernel, n_head, d_k)

    def full(shape):
        nd = len(shape)
        return pl.BlockSpec(shape, lambda b, qt, h, _nd=nd: (0,) * _nd)

    grid_spec = pltpu.PrefetchScalarGridSpec(
        num_scalar_prefetch=0,
        grid=(B, n_qt, n_head),
        in_specs=[
            pl.BlockSpec((1, block_q, D), lambda b, qt, h: (b, qt, 0)),   # x (query tile)
            pl.BlockSpec((1, L, D), lambda b, qt, h: (b, 0, 0)),          # x (full, for K/V)
            pl.BlockSpec((1, D, d_k), lambda b, qt, h: (h, 0, 0)),        # wq head slab
            pl.BlockSpec((1, D, d_k), lambda b, qt, h: (h, 0, 0)),        # wk head slab
            pl.BlockSpec((1, D, d_v), lambda b, qt, h: (h, 0, 0)),        # wv head slab
            pl.BlockSpec((1, d_v, D), lambda b, qt, h: (h, 0, 0)),        # wo head slab
            full((1, D)), full((1, D)),                                   # ln1 gamma/beta
            full((D, d_inner)), full((1, d_inner)),                       # w1, b1
            full((d_inner, D)), full((1, D)),                             # w2, b2
            full((1, D)), full((1, D)),                                   # ln2 gamma/beta
        ],
        out_specs=[
            pl.BlockSpec((1, block_q, D), lambda b, qt, h: (b, qt, 0)),       # enc_output
            pl.BlockSpec((1, 1, block_q, L), lambda b, qt, h: (b, h, qt, 0)),  # attn (key dim lane-dense)
        ],
        scratch_shapes=[pltpu.VMEM((block_q, D), jnp.float32)],           # mha accumulator
    )

    out_shapes = (
        jax.ShapeDtypeStruct((B, L, D), jnp.float32),
        jax.ShapeDtypeStruct((B, n_head, L, L), jnp.float32),
    )

    return pl.pallas_call(
        kernel,
        grid_spec=grid_spec,
        out_shape=out_shapes,
        compiler_params=pltpu.CompilerParams(
            dimension_semantics=("parallel", "parallel", "arbitrary"),
            vmem_limit_bytes=32 * 1024 * 1024,
        ),
    )(x, x, wq, wk, wv, wo,
      params["ln1_g"], params["ln1_b"],
      w1, params["b1"], w2, params["b2"],
      params["ln2_g"], params["ln2_b"])


def encoder_layer_ref(x, params, *, n_head, d_k, d_v):
    """Plain-JAX f32 reference (mirrors the PyTorch forward, eval mode)."""
    B, L, D = x.shape
    q = (x @ params["wq"]).reshape(B, L, n_head, d_k).transpose(0, 2, 1, 3)
    k = (x @ params["wk"]).reshape(B, L, n_head, d_k).transpose(0, 2, 1, 3)
    v = (x @ params["wv"]).reshape(B, L, n_head, d_v).transpose(0, 2, 1, 3)
    s = jnp.einsum("bhqd,bhkd->bhqk", q / (d_k ** 0.5), k)
    attn = jax.nn.softmax(s, axis=-1)
    o = jnp.einsum("bhqk,bhkd->bhqd", attn, v)
    o = o.transpose(0, 2, 1, 3).reshape(B, L, n_head * d_v)
    mha = o @ params["wo"]

    def ln(y, g, b):
        mu = jnp.mean(y, axis=-1, keepdims=True)
        var = jnp.mean((y - mu) ** 2, axis=-1, keepdims=True)
        return (y - mu) / jnp.sqrt(var + 1e-6) * g[0] + b[0]

    x1 = ln(mha + x, params["ln1_g"], params["ln1_b"])
    ff = jnp.maximum(x1 @ params["w1"] + params["b1"][0], 0.0) @ params["w2"] + params["b2"][0]
    out = ln(ff + x1, params["ln2_g"], params["ln2_b"])
    return out, attn


if __name__ == "__main__":
    # Small shapes consistent with the module.
    B, L = 2, 8
    d_model, d_inner = 32, 64
    n_head, d_k, d_v = 4, 8, 8

    key = jax.random.PRNGKey(0)
    ks = jax.random.split(key, 10)
    scale = 0.1
    params = {
        "wq": scale * jax.random.normal(ks[0], (d_model, n_head * d_k), jnp.float32),
        "wk": scale * jax.random.normal(ks[1], (d_model, n_head * d_k), jnp.float32),
        "wv": scale * jax.random.normal(ks[2], (d_model, n_head * d_v), jnp.float32),
        "wo": scale * jax.random.normal(ks[3], (n_head * d_v, d_model), jnp.float32),
        "ln1_g": jnp.ones((1, d_model), jnp.float32),
        "ln1_b": jnp.zeros((1, d_model), jnp.float32),
        "w1": scale * jax.random.normal(ks[4], (d_model, d_inner), jnp.float32),
        "b1": scale * jax.random.normal(ks[5], (1, d_inner), jnp.float32),
        "w2": scale * jax.random.normal(ks[6], (d_inner, d_model), jnp.float32),
        "b2": scale * jax.random.normal(ks[7], (1, d_model), jnp.float32),
        "ln2_g": jnp.ones((1, d_model), jnp.float32),
        "ln2_b": jnp.zeros((1, d_model), jnp.float32),
    }

    x = jax.random.normal(ks[8], (B, L, d_model), jnp.float32)

    out, attn = encoder_layer(x, params, n_head=n_head, d_k=d_k, d_v=d_v)
    out = jax.block_until_ready(out)
    attn = jax.block_until_ready(attn)

    out_ref, attn_ref = encoder_layer_ref(x, params, n_head=n_head, d_k=d_k, d_v=d_v)
    assert out.shape == (B, L, d_model) and attn.shape == (B, n_head, L, L)
    # bf16 MXU inputs with f32 accumulation -> slightly relaxed tolerance vs f32 ref.
    assert jnp.allclose(out, out_ref, atol=2e-2, rtol=2e-2)
    assert jnp.allclose(attn, attn_ref, atol=2e-2, rtol=2e-2)

    print("KERNEL_OK")
</pallas_src>

<mosaic_0001>
module attributes {stable_mosaic.version = 11 : i64} {
  func.func @_encoder_layer_kernel(%arg0: i32, %arg1: i32, %arg2: i32, %arg3: memref<1x8x32xf32, #tpu.memory_space<vmem>>, %arg4: memref<1x8x32xf32, #tpu.memory_space<vmem>>, %arg5: memref<1x32x8xbf16, #tpu.memory_space<vmem>>, %arg6: memref<1x32x8xbf16, #tpu.memory_space<vmem>>, %arg7: memref<1x32x8xbf16, #tpu.memory_space<vmem>>, %arg8: memref<1x8x32xbf16, #tpu.memory_space<vmem>>, %arg9: memref<1x32xf32, #tpu.memory_space<vmem>>, %arg10: memref<1x32xf32, #tpu.memory_space<vmem>>, %arg11: memref<32x64xbf16, #tpu.memory_space<vmem>>, %arg12: memref<1x64xf32, #tpu.memory_space<vmem>>, %arg13: memref<64x32xbf16, #tpu.memory_space<vmem>>, %arg14: memref<1x32xf32, #tpu.memory_space<vmem>>, %arg15: memref<1x32xf32, #tpu.memory_space<vmem>>, %arg16: memref<1x32xf32, #tpu.memory_space<vmem>>, %arg17: memref<1x8x32xf32, #tpu.memory_space<vmem>>, %arg18: memref<1x1x8x8xf32, #tpu.memory_space<vmem>>, %arg19: memref<8x32xf32, #tpu.memory_space<vmem>>) attributes {dimension_semantics = [#tpu.dimension_semantics<parallel>, #tpu.dimension_semantics<parallel>, #tpu.dimension_semantics<arbitrary>], iteration_bounds = array<i64: 2, 1, 4>, scalar_prefetch = 0 : i64, scratch_operands = 1 : i64, tpu.core_type = #tpu.core_type<tc>, window_params = [{transform_indices = @transform_0, window_bounds = array<i64: 1, 8, 32>}, {transform_indices = @transform_1, window_bounds = array<i64: 1, 8, 32>}, {transform_indices = @transform_2, window_bounds = array<i64: 1, 32, 8>}, {transform_indices = @transform_3, window_bounds = array<i64: 1, 32, 8>}, {transform_indices = @transform_4, window_bounds = array<i64: 1, 32, 8>}, {transform_indices = @transform_5, window_bounds = array<i64: 1, 8, 32>}, {pipeline_mode = #tpu.pipeline_mode<synchronous>, transform_indices = @transform_6, window_bounds = array<i64: 1, 32>}, {pipeline_mode = #tpu.pipeline_mode<synchronous>, transform_indices = @transform_7, window_bounds = array<i64: 1, 32>}, {pipeline_mode = #tpu.pipeline_mode<synchronous>, transform_indices = @transform_8, window_bounds = array<i64: 32, 64>}, {pipeline_mode = #tpu.pipeline_mode<synchronous>, transform_indices = @transform_9, window_bounds = array<i64: 1, 64>}, {pipeline_mode = #tpu.pipeline_mode<synchronous>, transform_indices = @transform_10, window_bounds = array<i64: 64, 32>}, {pipeline_mode = #tpu.pipeline_mode<synchronous>, transform_indices = @transform_11, window_bounds = array<i64: 1, 32>}, {pipeline_mode = #tpu.pipeline_mode<synchronous>, transform_indices = @transform_12, window_bounds = array<i64: 1, 32>}, {pipeline_mode = #tpu.pipeline_mode<synchronous>, transform_indices = @transform_13, window_bounds = array<i64: 1, 32>}, {transform_indices = @transform_14, window_bounds = array<i64: 1, 8, 32>}, {transform_indices = @transform_15, window_bounds = array<i64: 1, 1, 8, 8>}]} {
    %c0 = arith.constant 0 : index
    %c0_0 = arith.constant 0 : index
    %c0_1 = arith.constant 0 : index
    %0 = vector.load %arg3[%c0, %c0_0, %c0_1] : memref<1x8x32xf32, #tpu.memory_space<vmem>>, vector<1x8x32xf32>
    %1 = vector.shape_cast %0 : vector<1x8x32xf32> to vector<8x32xf32>
    %c0_2 = arith.constant 0 : index
    %c0_3 = arith.constant 0 : index
    %c0_4 = arith.constant 0 : index
    %2 = vector.load %arg4[%c0_2, %c0_3, %c0_4] : memref<1x8x32xf32, #tpu.memory_space<vmem>>, vector<1x8x32xf32>
    %3 = vector.shape_cast %2 : vector<1x8x32xf32> to vector<8x32xf32>
    %4 = arith.truncf %1 : vector<8x32xf32> to vector<8x32xbf16>
    %5 = arith.truncf %3 : vector<8x32xf32> to vector<8x32xbf16>
    %c0_5 = arith.constant 0 : index
    %c0_6 = arith.constant 0 : index
    %c0_7 = arith.constant 0 : index
    %6 = vector.load %arg5[%c0_5, %c0_6, %c0_7] : memref<1x32x8xbf16, #tpu.memory_space<vmem>>, vector<1x32x8xbf16>
    %7 = vector.shape_cast %6 : vector<1x32x8xbf16> to vector<32x8xbf16>
    %cst = arith.constant dense<0.000000e+00> : vector<8x8xf32>
    %8 = tpu.matmul %4, %7, %cst {dimension_numbers = #tpu.dot_dimension_numbers<[1], [0], [0], [1], [0, 0, 1, 1], [], []>} : vector<8x32xbf16>, vector<32x8xbf16>, vector<8x8xf32> -> vector<8x8xf32>
    %c0_8 = arith.constant 0 : index
    %c0_9 = arith.constant 0 : index
    %c0_10 = arith.constant 0 : index
    %9 = vector.load %arg6[%c0_8, %c0_9, %c0_10] : memref<1x32x8xbf16, #tpu.memory_space<vmem>>, vector<1x32x8xbf16>
    %10 = vector.shape_cast %9 : vector<1x32x8xbf16> to vector<32x8xbf16>
    %cst_11 = arith.constant dense<0.000000e+00> : vector<8x8xf32>
    %11 = tpu.matmul %5, %10, %cst_11 {dimension_numbers = #tpu.dot_dimension_numbers<[1], [0], [0], [1], [0, 0, 1, 1], [], []>} : vector<8x32xbf16>, vector<32x8xbf16>, vector<8x8xf32> -> vector<8x8xf32>
    %c0_12 = arith.constant 0 : index
    %c0_13 = arith.constant 0 : index
    %c0_14 = arith.constant 0 : index
    %12 = vector.load %arg7[%c0_12, %c0_13, %c0_14] : memref<1x32x8xbf16, #tpu.memory_space<vmem>>, vector<1x32x8xbf16>
    %13 = vector.shape_cast %12 : vector<1x32x8xbf16> to vector<32x8xbf16>
    %cst_15 = arith.constant dense<0.000000e+00> : vector<8x8xf32>
    %14 = tpu.matmul %5, %13, %cst_15 {dimension_numbers = #tpu.dot_dimension_numbers<[1], [0], [0], [1], [0, 0, 1, 1], [], []>} : vector<8x32xbf16>, vector<32x8xbf16>, vector<8x8xf32> -> vector<8x8xf32>
    %cst_16 = arith.constant 0.353553385 : f32
    %15 = vector.broadcast %cst_16 : f32 to vector<8x8xf32>
    %16 = arith.mulf %8, %15 : vector<8x8xf32>
    %17 = arith.truncf %16 : vector<8x8xf32> to vector<8x8xbf16>
    %18 = arith.truncf %11 : vector<8x8xf32> to vector<8x8xbf16>
    %cst_17 = arith.constant dense<0.000000e+00> : vector<8x8xf32>
    %19 = tpu.matmul %17, %18, %cst_17 {dimension_numbers = #tpu.dot_dimension_numbers<[1], [1], [0], [0], [0, 0, 1, 0], [], []>} : vector<8x8xbf16>, vector<8x8xbf16>, vector<8x8xf32> -> vector<8x8xf32>
    %cst_18 = arith.constant dense<0xFF800000> : vector<8xf32>
    %20 = vector.multi_reduction <maximumf>, %19, %cst_18 [1] : vector<8x8xf32> to vector<8xf32>
    %21 = vector.shape_cast %20 : vector<8xf32> to vector<8x1xf32>
    %22 = vector.broadcast %21 : vector<8x1xf32> to vector<8x8xf32>
    %23 = arith.subf %19, %22 : vector<8x8xf32>
    %24 = math.exp %23 : vector<8x8xf32>
    %cst_19 = arith.constant dense<0.000000e+00> : vector<8xf32>
    %25 = vector.multi_reduction <add>, %24, %cst_19 [1] : vector<8x8xf32> to vector<8xf32>
    %26 = vector.shape_cast %25 : vector<8xf32> to vector<8x1xf32>
    %27 = tpu.reciprocal %26 {approx = true} : vector<8x1xf32> -> vector<8x1xf32>
    %28 = vector.broadcast %27 : vector<8x1xf32> to vector<8x8xf32>
    %29 = arith.mulf %24, %28 : vector<8x8xf32>
    %c0_20 = arith.constant 0 : index
    %c0_21 = arith.constant 0 : index
    %c0_22 = arith.constant 0 : index
    %c0_23 = arith.constant 0 : index
    %30 = vector.load %arg18[%c0_20, %c0_21, %c0_22, %c0_23] : memref<1x1x8x8xf32, #tpu.memory_space<vmem>>, vector<1x1x8x8xf32>
    %31 = vector.shape_cast %30 : vector<1x1x8x8xf32> to vector<8x8xf32>
    %32 = vector.shape_cast %29 : vector<8x8xf32> to vector<1x1x8x8xf32>
    tpu.vector_store %arg18[%c0_20, %c0_21, %c0_22, %c0_23], %32 {strides = array<i32>} : memref<1x1x8x8xf32, #tpu.memory_space<vmem>>, vector<1x1x8x8xf32>,
    %33 = arith.truncf %29 : vector<8x8xf32> to vector<8x8xbf16>
    %34 = arith.truncf %14 : vector<8x8xf32> to vector<8x8xbf16>
    %cst_24 = arith.constant dense<0.000000e+00> : vector<8x8xf32>
    %35 = tpu.matmul %33, %34, %cst_24 {dimension_numbers = #tpu.dot_dimension_numbers<[1], [0], [0], [1], [0, 0, 1, 1], [], []>} : vector<8x8xbf16>, vector<8x8xbf16>, vector<8x8xf32> -> vector<8x8xf32>
    %36 = arith.truncf %35 : vector<8x8xf32> to vector<8x8xbf16>
    %c0_25 = arith.constant 0 : index
    %c0_26 = arith.constant 0 : index
    %c0_27 = arith.constant 0 : index
    %37 = vector.load %arg8[%c0_25, %c0_26, %c0_27] : memref<1x8x32xbf16, #tpu.memory_space<vmem>>, vector<1x8x32xbf16>
    %38 = vector.shape_cast %37 : vector<1x8x32xbf16> to vector<8x32xbf16>
    %cst_28 = arith.constant dense<0.000000e+00> : vector<8x32xf32>
    %39 = tpu.matmul %36, %38, %cst_28 {dimension_numbers = #tpu.dot_dimension_numbers<[1], [0], [0], [1], [0, 0, 1, 1], [], []>} : vector<8x8xbf16>, vector<8x32xbf16>, vector<8x32xf32> -> vector<8x32xf32>
    %c0_i32 = arith.constant 0 : i32
    %40 = arith.cmpi eq, %arg2, %c0_i32 : i32
    %41 = arith.extui %40 : i1 to i32
    %c0_i32_29 = arith.constant 0 : i32
    %42 = arith.cmpi ne, %41, %c0_i32_29 : i32
    scf.if %42 {
      %cst_35 = arith.constant 0.000000e+00 : f32
      %49 = vector.broadcast %cst_35 : f32 to vector<8x32xf32>
      %c0_36 = arith.constant 0 : index
      %c0_37 = arith.constant 0 : index
      %50 = vector.load %arg19[%c0_36, %c0_37] : memref<8x32xf32, #tpu.memory_space<vmem>>, vector<8x32xf32>
      tpu.vector_store %arg19[%c0_36, %c0_37], %49 {strides = array<i32>} : memref<8x32xf32, #tpu.memory_space<vmem>>, vector<8x32xf32>,
    } else {
    }
    %c0_30 = arith.constant 0 : index
    %c0_31 = arith.constant 0 : index
    %43 = vector.load %arg19[%c0_30, %c0_31] : memref<8x32xf32, #tpu.memory_space<vmem>>, vector<8x32xf32>
    %44 = arith.addf %43, %39 : vector<8x32xf32>
    %c0_32 = arith.constant 0 : index
    %c0_33 = arith.constant 0 : index
    %45 = vector.load %arg19[%c0_32, %c0_33] : memref<8x32xf32, #tpu.memory_space<vmem>>, vector<8x32xf32>
    tpu.vector_store %arg19[%c0_32, %c0_33], %44 {strides = array<i32>} : memref<8x32xf32, #tpu.memory_space<vmem>>, vector<8x32xf32>,
    %c3_i32 = arith.constant 3 : i32
    %46 = arith.cmpi eq, %arg2, %c3_i32 : i32
    %47 = arith.extui %46 : i1 to i32
    %c0_i32_34 = arith.constant 0 : i32
    %48 = arith.cmpi ne, %47, %c0_i32_34 : i32
    scf.if %48 {
      %c0_35 = arith.constant 0 : index
      %c0_36 = arith.constant 0 : index
      %49 = vector.load %arg19[%c0_35, %c0_36] : memref<8x32xf32, #tpu.memory_space<vmem>>, vector<8x32xf32>
      %50 = arith.addf %49, %1 : vector<8x32xf32>
      %cst_37 = arith.constant dense<0.000000e+00> : vector<8xf32>
      %51 = vector.multi_reduction <add>, %50, %cst_37 [1] : vector<8x32xf32> to vector<8xf32>
      %52 = vector.shape_cast %51 : vector<8xf32> to vector<8x1xf32>
      %cst_38 = arith.constant 3.200000e+01 : f32
      %53 = vector.broadcast %cst_38 : f32 to vector<8x1xf32>
      %54 = arith.divf %52, %53 : vector<8x1xf32>
      %55 = vector.broadcast %54 : vector<8x1xf32> to vector<8x32xf32>
      %56 = arith.subf %50, %55 : vector<8x32xf32>
      %57 = arith.mulf %56, %56 : vector<8x32xf32>
      %cst_39 = arith.constant dense<0.000000e+00> : vector<8xf32>
      %58 = vector.multi_reduction <add>, %57, %cst_39 [1] : vector<8x32xf32> to vector<8xf32>
      %59 = vector.shape_cast %58 : vector<8xf32> to vector<8x1xf32>
      %cst_40 = arith.constant 3.200000e+01 : f32
      %60 = vector.broadcast %cst_40 : f32 to vector<8x1xf32>
      %61 = arith.divf %59, %60 : vector<8x1xf32>
      %62 = vector.broadcast %54 : vector<8x1xf32> to vector<8x32xf32>
      %63 = arith.subf %50, %62 : vector<8x32xf32>
      %cst_41 = arith.constant 9.99999997E-7 : f32
      %64 = vector.broadcast %cst_41 : f32 to vector<8x1xf32>
      %65 = arith.addf %61, %64 : vector<8x1xf32>
      %66 = math.rsqrt %65 : vector<8x1xf32>
      %67 = vector.broadcast %66 : vector<8x1xf32> to vector<8x32xf32>
      %68 = arith.mulf %63, %67 : vector<8x32xf32>
      %c0_42 = arith.constant 0 : index
      %c0_43 = arith.constant 0 : index
      %69 = vector.load %arg9[%c0_42, %c0_43] : memref<1x32xf32, #tpu.memory_space<vmem>>, vector<1x32xf32>
      %70 = vector.shape_cast %69 : vector<1x32xf32> to vector<32xf32>
      %71 = vector.shape_cast %70 : vector<32xf32> to vector<1x32xf32>
      %72 = vector.broadcast %71 : vector<1x32xf32> to vector<8x32xf32>
      %73 = arith.mulf %68, %72 : vector<8x32xf32>
      %c0_44 = arith.constant 0 : index
      %c0_45 = arith.constant 0 : index
      %74 = vector.load %arg10[%c0_44, %c0_45] : memref<1x32xf32, #tpu.memory_space<vmem>>, vector<1x32xf32>
      %75 = vector.shape_cast %74 : vector<1x32xf32> to vector<32xf32>
      %76 = vector.shape_cast %75 : vector<32xf32> to vector<1x32xf32>
      %77 = vector.broadcast %76 : vector<1x32xf32> to vector<8x32xf32>
      %78 = arith.addf %73, %77 : vector<8x32xf32>
      %79 = arith.truncf %78 : vector<8x32xf32> to vector<8x32xbf16>
      %c0_46 = arith.constant 0 : index
      %c0_47 = arith.constant 0 : index
      %80 = vector.load %arg11[%c0_46, %c0_47] : memref<32x64xbf16, #tpu.memory_space<vmem>>, vector<32x64xbf16>
      %cst_48 = arith.constant dense<0.000000e+00> : vector<8x64xf32>
      %81 = tpu.matmul %79, %80, %cst_48 {dimension_numbers = #tpu.dot_dimension_numbers<[1], [0], [0], [1], [0, 0, 1, 1], [], []>} : vector<8x32xbf16>, vector<32x64xbf16>, vector<8x64xf32> -> vector<8x64xf32>
      %c0_49 = arith.constant 0 : index
      %c0_50 = arith.constant 0 : index
      %82 = vector.load %arg12[%c0_49, %c0_50] : memref<1x64xf32, #tpu.memory_space<vmem>>, vector<1x64xf32>
      %83 = vector.shape_cast %82 : vector<1x64xf32> to vector<64xf32>
      %84 = vector.shape_cast %83 : vector<64xf32> to vector<1x64xf32>
      %85 = vector.broadcast %84 : vector<1x64xf32> to vector<8x64xf32>
      %86 = arith.addf %81, %85 : vector<8x64xf32>
      %cst_51 = arith.constant 0.000000e+00 : f32
      %87 = vector.broadcast %cst_51 : f32 to vector<8x64xf32>
      %88 = arith.maximumf %86, %87 : vector<8x64xf32>
      %89 = arith.truncf %88 : vector<8x64xf32> to vector<8x64xbf16>
      %c0_52 = arith.constant 0 : index
      %c0_53 = arith.constant 0 : index
      %90 = vector.load %arg13[%c0_52, %c0_53] : memref<64x32xbf16, #tpu.memory_space<vmem>>, vector<64x32xbf16>
      %cst_54 = arith.constant dense<0.000000e+00> : vector<8x32xf32>
      %91 = tpu.matmul %89, %90, %cst_54 {dimension_numbers = #tpu.dot_dimension_numbers<[1], [0], [0], [1], [0, 0, 1, 1], [], []>} : vector<8x64xbf16>, vector<64x32xbf16>, vector<8x32xf32> -> vector<8x32xf32>
      %c0_55 = arith.constant 0 : index
      %c0_56 = arith.constant 0 : index
      %92 = vector.load %arg14[%c0_55, %c0_56] : memref<1x32xf32, #tpu.memory_space<vmem>>, vector<1x32xf32>
      %93 = vector.shape_cast %92 : vector<1x32xf32> to vector<32xf32>
      %94 = vector.shape_cast %93 : vector<32xf32> to vector<1x32xf32>
      %95 = vector.broadcast %94 : vector<1x32xf32> to vector<8x32xf32>
      %96 = arith.addf %91, %95 : vector<8x32xf32>
      %97 = arith.addf %96, %78 : vector<8x32xf32>
      %cst_57 = arith.constant dense<0.000000e+00> : vector<8xf32>
      %98 = vector.multi_reduction <add>, %97, %cst_57 [1] : vector<8x32xf32> to vector<8xf32>
      %99 = vector.shape_cast %98 : vector<8xf32> to vector<8x1xf32>
      %cst_58 = arith.constant 3.200000e+01 : f32
      %100 = vector.broadcast %cst_58 : f32 to vector<8x1xf32>
      %101 = arith.divf %99, %100 : vector<8x1xf32>
      %102 = vector.broadcast %101 : vector<8x1xf32> to vector<8x32xf32>
      %103 = arith.subf %97, %102 : vector<8x32xf32>
      %104 = arith.mulf %103, %103 : vector<8x32xf32>
      %cst_59 = arith.constant dense<0.000000e+00> : vector<8xf32>
      %105 = vector.multi_reduction <add>, %104, %cst_59 [1] : vector<8x32xf32> to vector<8xf32>
      %106 = vector.shape_cast %105 : vector<8xf32> to vector<8x1xf32>
      %cst_60 = arith.constant 3.200000e+01 : f32
      %107 = vector.broadcast %cst_60 : f32 to vector<8x1xf32>
      %108 = arith.divf %106, %107 : vector<8x1xf32>
      %109 = vector.broadcast %101 : vector<8x1xf32> to vector<8x32xf32>
      %110 = arith.subf %97, %109 : vector<8x32xf32>
      %cst_61 = arith.constant 9.99999997E-7 : f32
      %111 = vector.broadcast %cst_61 : f32 to vector<8x1xf32>
      %112 = arith.addf %108, %111 : vector<8x1xf32>
      %113 = math.rsqrt %112 : vector<8x1xf32>
      %114 = vector.broadcast %113 : vector<8x1xf32> to vector<8x32xf32>
      %115 = arith.mulf %110, %114 : vector<8x32xf32>
      %c0_62 = arith.constant 0 : index
      %c0_63 = arith.constant 0 : index
      %116 = vector.load %arg15[%c0_62, %c0_63] : memref<1x32xf32, #tpu.memory_space<vmem>>, vector<1x32xf32>
      %117 = vector.shape_cast %116 : vector<1x32xf32> to vector<32xf32>
      %118 = vector.shape_cast %117 : vector<32xf32> to vector<1x32xf32>
      %119 = vector.broadcast %118 : vector<1x32xf32> to vector<8x32xf32>
      %120 = arith.mulf %115, %119 : vector<8x32xf32>
      %c0_64 = arith.constant 0 : index
      %c0_65 = arith.constant 0 : index
      %121 = vector.load %arg16[%c0_64, %c0_65] : memref<1x32xf32, #tpu.memory_space<vmem>>, vector<1x32xf32>
      %122 = vector.shape_cast %121 : vector<1x32xf32> to vector<32xf32>
      %123 = vector.shape_cast %122 : vector<32xf32> to vector<1x32xf32>
      %124 = vector.broadcast %123 : vector<1x32xf32> to vector<8x32xf32>
      %125 = arith.addf %120, %124 : vector<8x32xf32>
      %c0_66 = arith.constant 0 : index
      %c0_67 = arith.constant 0 : index
      %c0_68 = arith.constant 0 : index
      %126 = vector.load %arg17[%c0_66, %c0_67, %c0_68] : memref<1x8x32xf32, #tpu.memory_space<vmem>>, vector<1x8x32xf32>
      %127 = vector.shape_cast %126 : vector<1x8x32xf32> to vector<8x32xf32>
      %128 = vector.shape_cast %125 : vector<8x32xf32> to vector<1x8x32xf32>
      tpu.vector_store %arg17[%c0_66, %c0_67, %c0_68], %128 {strides = array<i32>} : memref<1x8x32xf32, #tpu.memory_space<vmem>>, vector<1x8x32xf32>,
    } else {
    }
    return
  }
  func.func @transform_0(%arg0: i32, %arg1: i32, %arg2: i32) -> (i32, i32, i32) {
    %c0_i32 = arith.constant 0 : i32
    %c0_i32_0 = arith.constant 0 : i32
    return %arg0, %arg1, %c0_i32 : i32, i32, i32
  }
  func.func @transform_1(%arg0: i32, %arg1: i32, %arg2: i32) -> (i32, i32, i32) {
    %c0_i32 = arith.constant 0 : i32
    %c0_i32_0 = arith.constant 0 : i32
    %c0_i32_1 = arith.constant 0 : i32
    return %arg0, %c0_i32, %c0_i32_0 : i32, i32, i32
  }
  func.func @transform_2(%arg0: i32, %arg1: i32, %arg2: i32) -> (i32, i32, i32) {
    %c0_i32 = arith.constant 0 : i32
    %c0_i32_0 = arith.constant 0 : i32
    %c0_i32_1 = arith.constant 0 : i32
    return %arg2, %c0_i32, %c0_i32_0 : i32, i32, i32
  }
  func.func @transform_3(%arg0: i32, %arg1: i32, %arg2: i32) -> (i32, i32, i32) {
    %c0_i32 = arith.constant 0 : i32
    %c0_i32_0 = arith.constant 0 : i32
    %c0_i32_1 = arith.constant 0 : i32
    return %arg2, %c0_i32, %c0_i32_0 : i32, i32, i32
  }
  func.func @transform_4(%arg0: i32, %arg1: i32, %arg2: i32) -> (i32, i32, i32) {
    %c0_i32 = arith.constant 0 : i32
    %c0_i32_0 = arith.constant 0 : i32
    %c0_i32_1 = arith.constant 0 : i32
    return %arg2, %c0_i32, %c0_i32_0 : i32, i32, i32
  }
  func.func @transform_5(%arg0: i32, %arg1: i32, %arg2: i32) -> (i32, i32, i32) {
    %c0_i32 = arith.constant 0 : i32
    %c0_i32_0 = arith.constant 0 : i32
    %c0_i32_1 = arith.constant 0 : i32
    return %arg2, %c0_i32, %c0_i32_0 : i32, i32, i32
  }
  func.func @transform_6(%arg0: i32, %arg1: i32, %arg2: i32) -> (i32, i32) {
    %c0_i32 = arith.constant 0 : i32
    %c0_i32_0 = arith.constant 0 : i32
    %c0_i32_1 = arith.constant 0 : i32
    return %c0_i32, %c0_i32_0 : i32, i32
  }
  func.func @transform_7(%arg0: i32, %arg1: i32, %arg2: i32) -> (i32, i32) {
    %c0_i32 = arith.constant 0 : i32
    %c0_i32_0 = arith.constant 0 : i32
    %c0_i32_1 = arith.constant 0 : i32
    return %c0_i32, %c0_i32_0 : i32, i32
  }
  func.func @transform_8(%arg0: i32, %arg1: i32, %arg2: i32) -> (i32, i32) {
    %c0_i32 = arith.constant 0 : i32
    %c0_i32_0 = arith.constant 0 : i32
    %c0_i32_1 = arith.constant 0 : i32
    return %c0_i32, %c0_i32_0 : i32, i32
  }
  func.func @transform_9(%arg0: i32, %arg1: i32, %arg2: i32) -> (i32, i32) {
    %c0_i32 = arith.constant 0 : i32
    %c0_i32_0 = arith.constant 0 : i32
    %c0_i32_1 = arith.constant 0 : i32
    return %c0_i32, %c0_i32_0 : i32, i32
  }
  func.func @transform_10(%arg0: i32, %arg1: i32, %arg2: i32) -> (i32, i32) {
    %c0_i32 = arith.constant 0 : i32
    %c0_i32_0 = arith.constant 0 : i32
    %c0_i32_1 = arith.constant 0 : i32
    return %c0_i32, %c0_i32_0 : i32, i32
  }
  func.func @transform_11(%arg0: i32, %arg1: i32, %arg2: i32) -> (i32, i32) {
    %c0_i32 = arith.constant 0 : i32
    %c0_i32_0 = arith.constant 0 : i32
    %c0_i32_1 = arith.constant 0 : i32
    return %c0_i32, %c0_i32_0 : i32, i32
  }
  func.func @transform_12(%arg0: i32, %arg1: i32, %arg2: i32) -> (i32, i32) {
    %c0_i32 = arith.constant 0 : i32
    %c0_i32_0 = arith.constant 0 : i32
    %c0_i32_1 = arith.constant 0 : i32
    return %c0_i32, %c0_i32_0 : i32, i32
  }
  func.func @transform_13(%arg0: i32, %arg1: i32, %arg2: i32) -> (i32, i32) {
    %c0_i32 = arith.constant 0 : i32
    %c0_i32_0 = arith.constant 0 : i32
    %c0_i32_1 = arith.constant 0 : i32
    return %c0_i32, %c0_i32_0 : i32, i32
  }
  func.func @transform_14(%arg0: i32, %arg1: i32, %arg2: i32) -> (i32, i32, i32) {
    %c0_i32 = arith.constant 0 : i32
    %c0_i32_0 = arith.constant 0 : i32
    return %arg0, %arg1, %c0_i32 : i32, i32, i32
  }
  func.func @transform_15(%arg0: i32, %arg1: i32, %arg2: i32) -> (i32, i32, i32, i32) {
    %c0_i32 = arith.constant 0 : i32
    %c0_i32_0 = arith.constant 0 : i32
    return %arg0, %arg2, %arg1, %c0_i32 : i32, i32, i32, i32
  }
}

</mosaic_0001>

<bundles_post_ra>
// kernel: tpu_custom_call.1
= control target key start
LH: loop header
LB: loop body
LE: loop exit
PB: predicated region body
PF: predicated region fallthrough
CT: control target
= control target key end

     0   :  { %s2233_s0 = inlined_call_operand.vmem [shape: f32[2,8,32], index: 0, kind: input, shape index: {}]   ;;  %s2234_s1 = inlined_call_operand.vmem [shape: f32[2,8,32], index: 1, kind: input, shape index: {}]   ;;  %s2235_s2 = inlined_call_operand.vmem [shape: bf16[4,32,8], index: 2, kind: input, shape index: {}]   ;;  %s2236_s3 = inlined_call_operand.vmem [shape: bf16[4,32,8], index: 3, kind: input, shape index: {}]   ;;  %s2237_s4 = inlined_call_operand.vmem [shape: bf16[4,32,8], index: 4, kind: input, shape index: {}]   ;;  %s2238_s5 = inlined_call_operand.vmem [shape: bf16[4,8,32], index: 5, kind: input, shape index: {}]   ;;  %s2239_s6 = inlined_call_operand.vmem [shape: f32[1,32], index: 6, kind: input, shape index: {}]   ;;  %s2240_s7 = inlined_call_operand.vmem [shape: f32[1,32], index: 7, kind: input, shape index: {}]   ;;  %s2241_s8 = inlined_call_operand.vmem [shape: bf16[32,64], index: 8, kind: input, shape index: {}]   ;;  %s2242_s9 = inlined_call_operand.vmem [shape: f32[1,64], index: 9, kind: input, shape index: {}]   ;;  %s2243_s10 = inlined_call_operand.vmem [shape: bf16[64,32], index: 10, kind: input, shape index: {}]   ;;  %s2244_s11 = inlined_call_operand.vmem [shape: f32[1,32], index: 11, kind: input, shape index: {}]   ;;  %s2245_s12 = inlined_call_operand.vmem [shape: f32[1,32], index: 12, kind: input, shape index: {}]   ;;  %s2246_s13 = inlined_call_operand.vmem [shape: f32[1,32], index: 13, kind: input, shape index: {}]   ;;  %s2247_s14 = inlined_call_operand.hbm [shape: f32[2,8,32], index: 14, kind: output, shape index: {0}]   ;;  %s2248_s15 = inlined_call_operand.hbm [shape: f32[2,4,8,8], index: 15, kind: output, shape index: {1}]  }
   0x1   :  { %2264 = sst [smem:[#allocation20_spill]] %s2233_s0 }
   0x2   :  { %2265 = sst [smem:[#allocation21_spill]] %s2235_s2 }
   0x3   :  { %2266 = sst [smem:[#allocation22_spill]] %s2236_s3 }
   0x4   :  { %2267 = sst [smem:[#allocation23_spill]] %s2240_s7 }
   0x5   :  { %2268 = sst [smem:[#allocation24_spill]] %s2242_s9 }
   0x6   :  { %2269 = sst [smem:[#allocation25_spill]] %s2244_s11 }
   0x7   :  { %2270 = sst [smem:[#allocation26_spill]] %s2245_s12 }
   0x8   :  { %2271 = sst [smem:[#allocation27_spill]] %s2246_s13 }
   0x9   :  { %2272 = sst [smem:[#allocation28_spill]] %s2247_s14 }
   0xa   :  { %2273 = sst [smem:[#allocation29_spill]] %s2248_s15 }
   0xb   :  { %21 = vsyncpa [#allocation4], 0 }
   0xc   :  { %23 = vsyncpa [#allocation4 + $0x1], 0 }
   0xd   :  { %24 = vsyncpa [#allocation6], 0 }
   0xe   :  { %26 = vsyncpa [#allocation6 + $0x1], 0  ;;  %s1908_s18 = smov 0   ;;  %s1910_s19 = smov 0  }
   0xf   :  { %s1912_s20 = smov 0   ;;  %s1914_s21 = smov 0  }
  0x10   :  { %s1916_s22 = smov 0   ;;  %s1918_s23 = smov 0  }
  0x11   :  { %s1920_s24 = smov 0   ;;  %s1922_s25 = smov 0  }
  0x12   :  { %s1924_s26 = smov 0   ;;  %s1926_s27 = smov 0  }
  0x13   :  { %s1928_s28 = smov 0  }
  0x14 LB: > { %2274 = sst [smem:[#allocation9_spill]] %s1787_s20  ;;  %s1405_s29 = sadd.s32 4294967295, %s1819_s28   ;;  %s1819_s28 = sphi %s1928_s28, %s32_s28   ;;  %s1815_s27 = sphi %s1926_s27, %s2315_s27   ;;  %s1811_s26 = sphi %s1924_s26, %s2314_s26   ;;  %s1807_s25 = sphi %s1922_s25, %s2313_s25   ;;  %s1803_s24 = sphi %s1920_s24, %s2312_s24   ;;  %s1799_s23 = sphi %s1918_s23, %s2311_s23   ;;  %s1795_s22 = sphi %s1916_s22, %s2319_s22   ;;  %s1791_s21 = sphi %s1914_s21, %s2318_s21   ;;  %s1787_s20 = sphi %s1912_s20, %s2309_s20   ;;  %s1783_s19 = sphi %s1910_s19, %s2317_s19   ;;  %s1779_s18 = sphi %s1908_s18, %s2316_s18  }
  0x15   : > { %2275 = sst [smem:[#allocation10_spill]] %s1791_s21  ;;  %s1406_s30 = sadd.s32 4294967294, %s1819_s28  }
  0x16   : > { %2276 = sst [smem:[#allocation11_spill]] %s1799_s23  ;;  %s44_s16 = sadd.s32 1, %s1811_s26 }
  0x17   : > { %2277 = sst [smem:[#allocation12_spill]] %s1811_s26  ;;  %s51_s17 = sadd.s32 1, %s1815_s27 }
  0x18   : > { %2278 = sst [smem:[#allocation13_spill]] %s1815_s27  ;;  %p45_p0 = scmp.ge.s32.totalorder %s44_s16, 4 }
  0x19   : > { %s386_s15 = sadd.s32 1, %s1799_s23  ;;  %p396_p1 = scmp.ne.s32.totalorder %s1799_s23, %s1795_s22 }
  0x1a   : > { %p1970_p2 = scmp.eq.s32.totalorder %s1405_s29, 7  ;;  %s2321_s16 = smov (%p45_p0, %s44_s16), 0 }
  0x1b   : > { %2280 = sst [smem:[#allocation14_spill]] %s2321_s16  ;;  %s2323_s17 = smov (!%p45_p0, %s51_s17), %s1815_s27 }
  0x1c   : > { %p1979_p3 = por %p1970_p2, %p396_p1  ;;  %p402_p4 = scmp.ne.s32.totalorder %s1795_s22, %s1791_s21 }
  0x1d   : > { %p53_p5 = scmp.ge.s32.totalorder %s2323_s17, 2  ;;  %p1985_p6 = scmp.eq.s32.totalorder %s1406_s30, 7 }
  0x1e   : > { %s2281_s13 = scalar_select %p1979_p3, 1, 0 }
  0x1f   : > { %s410_s12 = ssub.s32 %s1811_s26, %s2321_s16  ;;  %s416_s11 = sadd.s32 1, %s1787_s20 }
  0x20   : > { %2282 = sst [smem:[#allocation15_spill]] %s2281_s13  ;;  %s2325_s17 = smov (%p53_p5, %s2323_s17), 0 }
  0x21   : > { %2284 = sst [smem:[#allocation16_spill]] %s2325_s17  ;;  %p1996_p7 = por %p1985_p6, %p402_p4 }
  0x22   : > { %p426_p8 = scmp.ne.s32.totalorder %s1787_s20, %s1783_s19  ;;  %s381_s21 = ssub.s32 %s1815_s27, %s2325_s17 }
  0x23   : > { %p432_p9 = scmp.ne.s32.totalorder %s1783_s19, %s1779_s18  ;;  %p384_p10 = scmp.eq.s32.totalorder %s381_s21, 0 }
  0x24   : > { %s411_s30 = sor.u32 %s410_s12, %s381_s21  ;;  %p2008_p12 = por %p426_p8, %p1970_p2 }
  0x25   : > { %p414_p11 = scmp.eq.s32.totalorder %s411_s30, 0  ;;  %p2020_p13 = por %p432_p9, %p1985_p6 }
  0x26   : > { %s2013_s16 = scalar_select %p384_p10, %s1799_s23, %s386_s15  }
  0x27   : > { %s2016_s26 = scalar_select %p414_p11, %s1787_s20, %s416_s11  }
  0x28   : > { %2287 = sst [smem:[#allocation17_spill]] %s2013_s16  ;;  %p1409_p0 = scmp.ge.s32.totalorder %s1819_s28, 1 }
  0x29   : > { %2288 = sst [smem:[#allocation18_spill]] %s2016_s26  ;;  %p523_p1 = scmp.lt.s32.totalorder %s1819_s28, 9 }
  0x2a   : > { %s2289_s7 = scalar_select %p2020_p13, 1, 0 }
  0x2b   : > { %p524_p4 = pnand %p1409_p0, %p523_p1 }
  0x2c   : > { %2290 = sst [smem:[#allocation19_spill]] %s2289_s7  ;;  %p612_p2 = scmp.lt.s32.totalorder (!%p524_p4), %s1803_s24, 3  ;;  %v1821_v0 = vmov (!%p524_p4), 0.0   ;;  %vm1822_vm0 = vmmov (!%p524_p4), 0   ;;  %vm652_vm1 = vcmask (!%p524_p4), 261120   ;;  %vm814_vm2 = vcmask (!%p524_p4), 64512  }
  0x2d   : > { %527 = sbr.rel (%p524_p4) target bundleno = 2373 (0x945), region = 76  ;;  %s2258_s12 = sand.u32 (!%p524_p4), 1, %s1795_s22   ;;  %1490 = vmatprep.subr.bf16.mxu1 (!%p524_p4), %v1821_v0  ;;  %1482 = vmatprep.subr.bf16.mxu0 (!%p524_p4), %v1821_v0  ;;  %vm878_vm3 = vcmask (!%p524_p4), 1043456  }
  0x2e   : > { %s2030_s11 = sshll.u32 (!%p524_p4), %s2258_s12, 3  ;;  %1494 = vmatprep.mubr.msk.bf16.mxu1 (!%p524_p4), %vm1822_vm0, %v1821_v0  ;;  %1486 = vmatprep.mubr.msk.bf16.mxu0 (!%p524_p4), %vm1822_vm0, %v1821_v0  ;;  %p601_p5 = scmp.lt.s32.totalorder (!%p524_p4), %s1807_s25, 1 }
  0x2f   : > { %s2291_s3 = sld [smem:[#allocation22_spill]] (!%p524_p4)  ;;  %s2292_s2 = sld [smem:[#allocation21_spill]] (!%p524_p4) }
  0x30   : > { %s2293_s0 = sld [smem:[#allocation20_spill]] (!%p524_p4)  ;;  %s2262_s23 = sand.u32 (!%p524_p4), 1, %s1783_s19  }
  0x31   : > { %s2081_s26 = sshll.u32 (!%p524_p4), %s2262_s23, 3  ;;  %p1433_p6 = scmp.ne.s32.totalorder (!%p524_p4), %s1803_s24, 0 }
  0x34   : > { %s2033_s14 = scalar_select %p612_p2, %s1803_s24, 3 }
  0x35   : > { %s602_s16 = scalar_select %p601_p5, %s1807_s25, 1 }
  0x36   : > { %s1456_s15 = sshll.u32 %s2033_s14, 4  ;;  %v1823_v54 = vmov (!%p1433_p6), 0.0  }
  0x37   : > { %s621_s30 = scalar_lea.vmem %s2291_s3, %s1456_s15  ;;  %s616_s12 = scalar_lea.vmem %s2292_s2, %s1456_s15  ;;  %974 = vst.msk [vmem:[#allocation2] sm:$0xff] (!%p1433_p6), %vm652_vm1, %v1823_v54 }
  0x38   : > { %v1649_v1 = vld [vmem:[%s621_s30] sm:$0xff]   ;;  %v1651_v3 = vld [vmem:[%s621_s30 + $0x8] sm:$0xff]   ;;  %s2049_s20 = scalar_lea.vmem %s2237_s4, %s1456_s15  ;;  %s1412_s7 = sshll.u32 %s602_s16, 3 }
  0x39   : > { %v1650_v2 = vld [vmem:[%s616_s12] sm:$0xff]   ;;  %1491 = vmatpush3.bf16.msra.mxu1 %v1649_v1  ;;  %v1652_v4 = vld [vmem:[%s616_s12 + $0x8] sm:$0xff]   ;;  %s611_s3 = scalar_lea.vmem %s2234_s1, %s1412_s7  ;;  %s607_s2 = scalar_lea.vmem %s2293_s0, %s1412_s7 }
  0x3a   : > { %1492 = vmatprep.subr.bf16.mxu1 %v1821_v0  ;;  %1483 = vmatpush3.bf16.msra.mxu0 %v1650_v2  ;;  %v633_v5 = vld [vmem:[%s611_s3] sm:$0xff]  ;;  %v1654_v22 = vld [vmem:[%s2049_s20 + $0x8] sm:$0xff]   ;;  %s2263_s16 = scalar_lea.vmem [#allocation5], %s2081_s26  ;;  %s593_s12 = scalar_lea.vmem [#allocation3], %s2030_s11 }
  0x3b   : > { %1484 = vmatprep.subr.bf16.mxu0 %v1821_v0  ;;  %v2057_v6 = vld [vmem:[%s607_s2] sm:$0xff]  ;;  %v635_v7 = vpack.c.bf16 %v633_v5, %v633_v5  ;;  %s1420_s2 = sshll.u32 %s2033_s14, 2 }
  0x3c   : > { %v634_v8 = vpack.c.bf16 %v2057_v6, %v2057_v6  ;;  %v1653_v21 = vld [vmem:[%s2049_s20] sm:$0xff]   ;;  %s630_s20 = scalar_lea.vmem %s2238_s5, %s1420_s2 }
  0x3d   : > { %1493 = vmatpush3.bf16.msra.mxu1 %v1651_v3  ;;  %v923_v39 = vld [vmem:[%s630_s20] sm:$0xf] }
  0x3e   : > { %1485 = vmatpush3.bf16.msra.mxu0 %v1652_v4  ;;  %1506 = vmatprep.subr.bf16.mxu1 %v1821_v0  ;;  %v928_v40 = vsel %vm878_vm3, %v923_v39, 0 }
  0x3f   : > { %1498 = vmatprep.subr.bf16.mxu0 %v1821_v0 }
  0x40   : > { %1495 = vmatmul.mubr.msk.bf16.vlgmr.msra.gmra.mrb[0].mxu1 %vm652_vm1, %v635_v7 }
  0x41   : > { %1487 = vmatmul.mubr.msk.bf16.vlgmr.msra.gmra.mrb[0].mxu0 %vm652_vm1, %v634_v8  ;;  %1508 = vmatprep.mubr.msk.bf16.mxu1 %vm1822_vm0, %v1821_v0 }
  0x42   : > { %1502 = vmatprep.mubr.msk.bf16.mxu0 %vm1822_vm0, %v1821_v0  ;;  %1499 = vmatpush3.bf16.msra.mxu0 %v1653_v21 }
  0x43   : > { %1500 = vmatprep.subr.bf16.mxu0 %v1821_v0 }
  0x46   : > { %1501 = vmatpush3.bf16.msra.mxu0 %v1654_v22 }
  0x47   : > { %1512 = vmatprep.subr.bf16.mxu0 %v1821_v0 }
  0x49   : > { %1503 = vmatmul.mubr.msk.bf16.vlgmr.msra.gmra.mrb[4].mxu0 %vm652_vm1, %v635_v7 }
  0x4a   : > { %1514 = vmatprep.mubr.msk.bf16.mxu0 %vm1822_vm0, %v1821_v0 }
 0x113   : > { %v749_v9 = vpop.f32.mrb[0].mxu1 }
 0x114   : > { %v813_v10 = vpack.c.bf16 %v749_v9, %v749_v9  ;;  %v1496_v11 = vpop.f32.mrb[1].mxu1  ;;  %v690_v12 = vpop.f32.mrb[0].mxu0 }
 0x115   : > { %v752_v13 = vpop.f32.mrb[2].mxu1  ;;  %v1488_v14 = vpop.f32.mrb[1].mxu0  ;;  %v811_v17 = vmul.f32 0.35355338, %v690_v12 }
 0x116   : > { %v819_v15 = vsel %vm814_vm2, %v813_v10, 0  ;;  %v1497_v16 = vpop.f32.mrb[3].mxu1  ;;  %v693_v18 = vpop.f32.mrb[2].mxu0 }
 0x117   : > { %1507 = vmatpush3.bf16.xpose.msra.mxu1 %v819_v15  ;;  %v1489_v19 = vpop.f32.mrb[3].mxu0  ;;  %v812_v20 = vpack.c.bf16 %v811_v17, %v811_v17 }
 0x118   : > { %1518 = vmatprep.subr.bf16.mxu1 %v1821_v0 }
 0x11c   : > { %v805_v33 = vpop.f32.mrb[4].mxu0 }
 0x11d   : > { %v1504_v34 = vpop.f32.mrb[5].mxu0  ;;  %v874_v37 = vpack.c.bf16 %v805_v33, %v805_v33 }
 0x11e   : > { %1509 = vmatmul.mubr.msk.bf16.vlgmr.msra.gmra.mrb[4].mxu1 %vm814_vm2, %v812_v20  ;;  %v808_v35 = vpop.f32.mrb[6].mxu0 }
 0x11f   : > { %1520 = vmatprep.mubr.msk.bf16.mxu1 %vm1822_vm0, %v1821_v0  ;;  %v1505_v36 = vpop.f32.mrb[7].mxu0  ;;  %v880_v38 = vsel %vm878_vm3, %v874_v37, 0  ;;  %1519 = vmatpush3.bf16.msra.mxu1 %v928_v40 }
 0x120   : > { %1513 = vmatpush3.bf16.msra.mxu0 %v880_v38 }
 0x1f1   : > { %v855_v23 = vpop.f32.mrb[4].mxu1 }
 0x1f2   : > { %v1510_v24 = vpop.f32.mrb[5].mxu1  ;;  %v861_v25 = vsel %vm814_vm2, %v855_v23, -inf }
 0x1f3   : > { %862 = vmax.xlane.f32.xlu0 %v861_v25  ;;  %v858_v26 = vpop.f32.mrb[6].mxu1 }
 0x1f4   : > { %v1511_v27 = vpop.f32.mrb[7].mxu1 }
 0x280   : > { %v863_v28 = vpop.xlane.xlu0 %862 }
 0x281   : > { %v864_v29 = vsub.f32 %v855_v23, %v863_v28 }
 0x283   : > { %v865_v30 = vmul.f32 1.442695, %v864_v29 }
 0x285   : > { %1655 = vpow2.f32 %v865_v30 }
 0x28f   : > { %v1656_v31 = vpop.eup %1655 }
 0x290   : > { %v867_v32 = vsel %vm814_vm2, %v1656_v31, 0.0 }
 0x291   : > { %868 = vadd.xlane.f32.xlu0 %v867_v32 }
 0x31e   : > { %v869_v41 = vpop.xlane.xlu0 %868 }
 0x31f   : > { %1657 = vrcp.f32 %v869_v41 }
 0x329   : > { %v1658_v42 = vpop.eup %1657 }
 0x32a   : > { %v871_v43 = vmul.f32 %v1658_v42, %v1656_v31 }
 0x32c   : > { %872 = vst.msk [vmem:[%s2263_s16] sm:$0xff] %vm814_vm2, %v871_v43  ;;  %v873_v44 = vpack.c.bf16 %v871_v43, %v871_v43 }
 0x32e   : > { %1515 = vmatmul.mubr.msk.bf16.vlgmr.msra.gmra.mrb[8].mxu0 %vm814_vm2, %v873_v44 }
 0x401   : > { %v916_v45 = vpop.f32.mrb[8].mxu0 }
 0x402   : > { %v922_v46 = vpack.c.bf16 %v916_v45, %v916_v45  ;;  %v1516_v47 = vpop.f32.mrb[9].mxu0 }
 0x403   : > { %v919_v48 = vpop.f32.mrb[10].mxu0 }
 0x404   : > { %v1517_v49 = vpop.f32.mrb[11].mxu0  ;;  %1521 = vmatmul.mubr.msk.bf16.vlgmr.msra.gmra.mrb[8].mxu1 %vm814_vm2, %v922_v46 }
 0x4d4   : > { %973 = sbr.rel (%p1433_p6) target bundleno = 1243 (0x4db), region = 80 }
 0x4d7   : > { %v964_v50 = vpop.f32.mrb[8].mxu1 }
 0x4d8   : > { %v1522_v51 = vpop.f32.mrb[9].mxu1 }
 0x4d9   : > { %v967_v52 = vpop.f32.mrb[10].mxu1 }
 0x4da   : > { %v1523_v53 = vpop.f32.mrb[11].mxu1 }
 0x4db PF: > { %v975_v55 = vld [vmem:[#allocation2] sm:$0xff]  ;;  %p1434_p8 = scmp.ne.s32.totalorder %s1803_s24, 3 }
 0x4dc   : > { %v976_v56 = vadd.f32 %v975_v55, %v964_v50  ;;  %v1659_v1 = vld [vmem:[%s2241_s8] sm:$0xff] (!%p1434_p8)   ;;  %v1824_v2 = vmov (!%p1434_p8), 0.0   ;;  %vm1825_vm4 = vmmov (!%p1434_p8), 0   ;;  %v1660_v3 = vld [vmem:[%s2241_s8 + $0x8] sm:$0xff] (!%p1434_p8)   ;;  %s2294_s15 = sld [smem:[#allocation23_spill]] (!%p1434_p8)  ;;  %v1663_v16 = vld [vmem:[%s2243_s10 + $0x10] sm:$0xff] (!%p1434_p8)  }
 0x4dd   : > { %981 = sbr.rel (%p1434_p8) target bundleno = 2319 (0x90f), region = 84  ;;  %1524 = vmatprep.subr.bf16.mxu0 (!%p1434_p8), %v1824_v2  ;;  %1528 = vmatprep.mubr.msk.bf16.mxu0 (!%p1434_p8), %vm1825_vm4, %v1824_v2  ;;  %v1661_v4 = vld [vmem:[%s2243_s10] sm:$0xff] (!%p1434_p8)   ;;  %v1662_v5 = vld [vmem:[%s2243_s10 + $0x8] sm:$0xff] (!%p1434_p8)   ;;  %v1664_v17 = vld [vmem:[%s2243_s10 + $0x18] sm:$0xff] (!%p1434_p8)   ;;  %s2295_s3 = sld [smem:[#allocation24_spill]] (!%p1434_p8)  ;;  %vm1122_vm5 = vcmask (!%p1434_p8), 523264  }
 0x4de   : > { %977 = vst.msk [vmem:[#allocation2] sm:$0xff] %vm652_vm1, %v976_v56  ;;  %1525 = vmatpush3.bf16.msra.mxu0 (!%p1434_p8), %v1659_v1  ;;  %1532 = vmatprep.subr.bf16.mxu1 (!%p1434_p8), %v1824_v2  ;;  %v1435_v10 = vld [vmem:[%s2239_s6] ss:$0 sm:$0xff] (!%p1434_p8)  ;;  %s2296_s14 = sld [smem:[#allocation25_spill]] (!%p1434_p8)  ;;  %s2297_s21 = sld [smem:[#allocation26_spill]] (!%p1434_p8) }
 0x4df   : > { %1526 = vmatprep.subr.bf16.mxu0 (!%p1434_p8), %v1824_v2  ;;  %1540 = vmatprep.mubr.msk.bf16.mxu1 (!%p1434_p8), %vm1825_vm4, %v1824_v2  ;;  %s2298_s17 = sld [smem:[#allocation27_spill]] (!%p1434_p8) }
 0x4e0   : > { %1533 = vmatpush3.bf16.msra.mxu1 (!%p1434_p8), %v1661_v4 }
 0x4e1   : > { %1534 = vmatprep.subr.bf16.mxu1 (!%p1434_p8), %v1824_v2 }
 0x4e2   : > { %1527 = vmatpush3.bf16.msra.mxu0 (!%p1434_p8), %v1660_v3  ;;  %v1436_v12 = vld [vmem:[%s2294_s15] ss:$0 sm:$0xff] (!%p1434_p8) }
 0x4e3   : > { %v1437_v18 = vld [vmem:[%s2295_s3] ss:$0 sm:$0xff] (!%p1434_p8) }
 0x4e4   : > { %1535 = vmatpush3.bf16.msra.mxu1 %v1662_v5  ;;  %v1441_v26 = vld [vmem:[%s2296_s14] ss:$0 sm:$0xff] }
 0x4e5   : > { %v982_v57 = vld [vmem:[#allocation2] sm:$0xff]  ;;  %1536 = vmatprep.subr.bf16.mxu1 %v1824_v2 }
 0x4e6   : > { %v983_v58 = vadd.f32 %v982_v57, %v2057_v6  ;;  %v1447_v43 = vld [vmem:[%s2297_s21] ss:$0 sm:$0xff] }
 0x4e7   : > { %v1448_v45 = vld [vmem:[%s2298_s17] ss:$0 sm:$0xff] }
 0x4e8   : > { %v984_v59 = vsel %vm652_vm1, %v983_v58, 0.0  ;;  %1537 = vmatpush3.bf16.msra.mxu1 %v1663_v16 }
 0x4e9   : > { %985 = vadd.xlane.f32.xlu0 %v984_v59  ;;  %1538 = vmatprep.subr.bf16.mxu1 %v1824_v2 }
 0x4ec   : > { %1539 = vmatpush3.bf16.msra.mxu1 %v1664_v17 }
 0x576   : > { %v986_v60 = vpop.xlane.xlu0 %985 }
 0x577   : > { %v988_v61 = vmul.f32 0.03125, %v986_v60 }
 0x579   : > { %v989_v62 = vsub.f32 %v983_v58, %v988_v61 }
 0x57b   : > { %v990_v63 = vmul.f32 %v989_v62, %v989_v62 }
 0x57d   : > { %v991_v0 = vsel %vm652_vm1, %v990_v63, 0.0 }
 0x57e   : > { %992 = vadd.xlane.f32.xlu0 %v991_v0 }
 0x60b   : > { %v993_v6 = vpop.xlane.xlu0 %992 }
 0x60c   : > { %v994_v7 = vmul.f32 0.03125, %v993_v6 }
 0x60e   : > { %v995_v8 = vadd.f32 1e-06, %v994_v7 }
 0x610   : > { %1665 = vrsqrt.f32 %v995_v8 }
 0x61a   : > { %v1666_v9 = vpop.eup %1665 }
 0x61b   : > { %v997_v11 = vmul.f32 %v1666_v9, %v989_v62 }
 0x61d   : > { %v1005_v13 = vmul.f32 %v1435_v10, %v997_v11 }
 0x61f   : > { %v1013_v14 = vadd.f32 %v1436_v12, %v1005_v13 }
 0x621   : > { %v1014_v15 = vpack.c.bf16 %v1013_v14, %v1013_v14 }
 0x623   : > { %1529 = vmatmul.mubr.msk.bf16.vlgmr.msra.gmra.mrb[0].mxu0 %vm652_vm1, %v1014_v15 }
 0x6f6   : > { %v1075_v19 = vpop.f32.mrb[0].mxu0 }
 0x6f7   : > { %v1076_v20 = vadd.f32 %v1437_v18, %v1075_v19  ;;  %v1530_v21 = vpop.f32.mrb[1].mxu0 }
 0x6f8   : > { %v1078_v22 = vpop.f32.mrb[2].mxu0 }
 0x6f9   : > { %v1081_v23 = vmax.f32 %v1076_v20, 0.0  ;;  %v1531_v24 = vpop.f32.mrb[3].mxu0 }
 0x6fb   : > { %v1082_v25 = vpack.c.bf16 %v1081_v23, %v1081_v23 }
 0x6fd   : > { %1541 = vmatmul.mubr.msk.bf16.vlgmr.msra.gmra.mrb[0].mxu1 %vm1122_vm5, %v1082_v25 }
 0x7d0   : > { %v1160_v27 = vpop.f32.mrb[0].mxu1 }
 0x7d1   : > { %v1161_v28 = vadd.f32 %v1441_v26, %v1160_v27  ;;  %v1542_v29 = vpop.f32.mrb[1].mxu1 }
 0x7d2   : > { %v1163_v30 = vpop.f32.mrb[2].mxu1 }
 0x7d3   : > { %v1543_v31 = vpop.f32.mrb[3].mxu1  ;;  %v1166_v32 = vadd.f32 %v1161_v28, %v1013_v14 }
 0x7d5   : > { %v1167_v33 = vsel %vm652_vm1, %v1166_v32, 0.0 }
 0x7d6   : > { %1168 = vadd.xlane.f32.xlu1 %v1167_v33 }
 0x863   : > { %v1169_v34 = vpop.xlane.xlu1 %1168 }
 0x864   : > { %v1170_v35 = vmul.f32 0.03125, %v1169_v34 }
 0x866   : > { %v1171_v36 = vsub.f32 %v1166_v32, %v1170_v35 }
 0x868   : > { %v1172_v37 = vmul.f32 %v1171_v36, %v1171_v36 }
 0x86a   : > { %v1173_v38 = vsel %vm652_vm1, %v1172_v37, 0.0 }
 0x86b   : > { %1174 = vadd.xlane.f32.xlu1 %v1173_v38 }
 0x8f8   : > { %v1175_v39 = vpop.xlane.xlu1 %1174 }
 0x8f9   : > { %v1176_v40 = vmul.f32 0.03125, %v1175_v39 }
 0x8fb   : > { %v1177_v41 = vadd.f32 1e-06, %v1176_v40 }
 0x8fd   : > { %1667 = vrsqrt.f32 %v1177_v41 }
 0x907   : > { %v1668_v42 = vpop.eup %1667 }
 0x908   : > { %v1179_v44 = vmul.f32 %v1668_v42, %v1171_v36 }
 0x90a   : > { %v1187_v46 = vmul.f32 %v1447_v43, %v1179_v44 }
 0x90c   : > { %v1195_v47 = vadd.f32 %v1448_v45, %v1187_v46 }
 0x90e   : > { %1196 = vst.msk [vmem:[%s593_s12] sm:$0xff] %vm652_vm1, %v1195_v47 }
 0x90f PF: > { %s1451_s3 = sshll.u32 %s1807_s25, 7  ;;  %s2300_s14 = sld [smem:[#allocation28_spill]] }
 0x910   : > { %s1217_s30 = sshll.u32 %s593_s12, 4  ;;  %s2301_s21 = sand.u32 1, %s1795_s22   ;;  %s1218_s30 = int_to_ptr.vmem [resolvable:$true] %s1217_s30 }
 0x911   : > { %s1198_s29 = scalar_lea.sflag [#allocation4], %s2301_s21  ;;  %s1669_s27 = scalar_lea.vmem %s1218_s30, 128 }
 0x912   : > { %p1670_p9 = scmp.ne.s32.totalorder %s1218_s30, %s1669_s27  ;;  %s1826_s17 = smov [#allocation3]  }
 0x913   : > { %s1673_s23 = sshll.u32 %s1826_s17, 4  ;;  %s1674_s23 = int_to_ptr.vmem [resolvable:$false] %s1673_s23 }
 0x914   : > { %p1671_p10 = pnand %p1670_p9, %p1979_p3  ;;  %s1675_s16 = scalar_lea.vmem %s1674_s23, 256 }
 0x915   : > { %s2143_s15 = scalar_lea.hbm %s2300_s14, %s1451_s3  ;;  %p1676_p0 = scmp.lt.s32.totalorder %s1218_s30, %s1674_s23 }
 0x916   : > { %p1672_p11 = pneg %p1671_p10  ;;  %p1677_p1 = scmp.lt.s32.totalorder %s1675_s16, %s1669_s27 }
 0x918   : > { %p1678_p4 = por %p1677_p1, %p1676_p0 }
 0x91a   : > { %p1679_p2 = pnand %p1678_p4, %p1672_p11 }
 0x91c   : > { %1682 = shalt.err (!%p1679_p2)
}
 0x91d   : > { %s1683_s11 = scalar_lea.hbm %s2143_s15, 128  ;;  %s1687_s7 = scalar_lea.hbm %s2300_s14, 256 }
 0x91e   : > { %p1684_p5 = scmp.ne.s32.totalorder %s2143_s15, %s1683_s11  ;;  %p1688_p9 = scmp.lt.u32.totalorder %s2143_s15, %s2300_s14 }
 0x91f   : > { %p1689_p10 = scmp.lt.u32.totalorder %s1687_s7, %s1683_s11  ;;  %p1691_p0 = scmp.lt.u32.totalorder %s1683_s11, %s2143_s15 }
 0x920   : > { %p1685_p6 = pnand %p1684_p5, %p1979_p3 }
 0x921   : > { %p1690_p11 = por %p1689_p10, %p1688_p9 }
 0x922   : > { %p1686_p8 = pneg %p1685_p6 }
 0x923   : > { %p1692_p1 = por %p1691_p0, %p1690_p11 }
 0x925   : > { %p1693_p4 = pnand %p1692_p1, %p1686_p8 }
 0x927   : > { %1696 = shalt.err (!%p1693_p4)
}
 0x928   : > { %1544 = dma.vmem_to_hbm [thread:$0]  (%p1979_p3), %s1218_s30, 128, %s2143_s15, %s1198_s29  }
 0x929   : > { %s1452_s16 = sshll.u32 %s1807_s25, 2  ;;  %s2302_s21 = scalar_lea.vmem [#allocation5], %s2081_s26 }
 0x92a   : > { %s1233_s27 = sshll.u32 %s2302_s21, 4  ;;  %s1229_s17 = sadd.s32 %s1803_s24, %s1452_s16  ;;  %s2170_s27 = int_to_ptr.vmem [resolvable:$true] %s1233_s27 }
 0x92b   : > { %s1453_s11 = sshll.u32 %s1229_s17, 7  ;;  %s2303_s2 = sld [smem:[#allocation29_spill]] }
 0x92c   : > { %s2304_s20 = sand.u32 1, %s1783_s19   ;;  %s1697_s0 = scalar_lea.vmem %s2170_s27, 128 }
 0x92d   : > { %s1203_s23 = scalar_lea.sflag [#allocation6], %s2304_s20  ;;  %p1698_p2 = scmp.ne.s32.totalorder %s2170_s27, %s1697_s0 }
 0x92e   : > { %s1827_s25 = smov [#allocation5]  }
 0x92f   : > { %p1699_p3 = pnand %p1698_p2, %p2008_p12  ;;  %s1701_s26 = sshll.u32 %s1827_s25, 4  ;;  %s1702_s26 = int_to_ptr.vmem [resolvable:$false] %s1701_s26 }
 0x930   : > { %s1703_s24 = scalar_lea.vmem %s1702_s26, 256  ;;  %p1704_p6 = scmp.lt.s32.totalorder %s2170_s27, %s1702_s26 }
 0x931   : > { %s1231_s7 = scalar_lea.hbm %s2303_s2, %s1453_s11  ;;  %p1700_p5 = pneg %p1699_p3 }
 0x932   : > { %p1705_p8 = scmp.lt.s32.totalorder %s1703_s24, %s1697_s0 }
 0x934   : > { %p1706_p9 = por %p1705_p8, %p1704_p6 }
 0x936   : > { %p1707_p10 = pnand %p1706_p9, %p1700_p5 }
 0x938   : > { %1710 = shalt.err (!%p1707_p10)
}
 0x939   : > { %s1711_s15 = scalar_lea.hbm %s1231_s7, 128  ;;  %s1715_s16 = scalar_lea.hbm %s2303_s2, 1024 }
 0x93a   : > { %p1712_p11 = scmp.ne.s32.totalorder %s1231_s7, %s1711_s15  ;;  %p1716_p4 = scmp.lt.u32.totalorder %s1231_s7, %s2303_s2 }
 0x93b   : > { %p1717_p2 = scmp.lt.u32.totalorder %s1715_s16, %s1711_s15  ;;  %p1719_p13 = scmp.lt.u32.totalorder %s1711_s15, %s1231_s7 }
 0x93c   : > { %p1713_p0 = pnand %p1712_p11, %p2008_p12 }
 0x93d   : > { %p1718_p3 = por %p1717_p2, %p1716_p4 }
 0x93e   : > { %p1714_p1 = pneg %p1713_p0 }
 0x93f   : > { %p1720_p6 = por %p1719_p13, %p1718_p3 }
 0x941   : > { %p1721_p5 = pnand %p1720_p6, %p1714_p1 }
 0x943   : > { %1724 = shalt.err (!%p1721_p5)
}
 0x944   : > { %1545 = dma.vmem_to_hbm [thread:$0]  (%p2008_p12), %s2170_s27, 128, %s1231_s7, %s1203_s23  }
 0x945 PF: > { %s2305_s0 = sld [smem:[#allocation10_spill]]  ;;  %p1555_p8 = scmp.ge.s32.totalorder %s1819_s28, 2 }
 0x947   : > { %p1549_p9 = pnand %p1555_p8, %p1996_p7 }
 0x94b   : > { %s1245_s11 = sand.u32 1, %s2305_s0  }
 0x94c   : > { %s1246_s12 = scalar_lea.sflag [#allocation4], %s1245_s11 }
 0x94d   : > { %1770 = dma.done.wait (!%p1549_p9), %s1246_s12, 128  }
 0x94e   : > { %1772 = vsyncadd (!%p1549_p9), %s1246_s12, 4294967168  ;;  %s2306_s3 = sld [smem:[#allocation19_spill]]  ;;  %s1254_s20 = sand.u32 1, %s1779_s18  }
 0x94f   : > { %s1255_s25 = scalar_lea.sflag [#allocation6], %s1254_s20 }
 0x954   : > { %p2307_p13 = scmp.ne.s32.totalorder %s2306_s3, 0 }
 0x956   : > { %p1552_p10 = pnand %p1555_p8, %p2307_p13 }
 0x958   : > { %1774 = dma.done.wait (!%p1552_p10), %s1255_s25, 128  }
 0x959   : > { %1776 = vsyncadd (!%p1552_p10), %s1255_s25, 4294967168  ;;  %s32_s28 = sadd.s32 1, %s1819_s28   ;;  %s2308_s13 = sld [smem:[#allocation9_spill]] }
 0x95a   : > { %p29_p12 = scmp.ge.s32.totalorder %s32_s28, 10   ;;  %s2309_s20 = sld [smem:[#allocation18_spill]] }
 0x95b   : > { %s2310_s9 = sld [smem:[#allocation11_spill]]  ;;  %s2311_s23 = sld [smem:[#allocation17_spill]] }
 0x95c   : > { %s2312_s24 = sld [smem:[#allocation12_spill]]  ;;  %s2313_s25 = sld [smem:[#allocation13_spill]] }
 0x95d   : > { %s2314_s26 = sld [smem:[#allocation14_spill]]  ;;  %s2315_s27 = sld [smem:[#allocation16_spill]] }
 0x95e   : > { %s2316_s18 = smov %s1783_s19  ;;  %s2318_s21 = smov %s1795_s22 }
 0x95f   : > { %s2317_s19 = smov %s2308_s13  ;;  %31 = sbr.rel (!%p29_p12) target bundleno = 20 (0x14), region = 151 }
 0x961   : > { %s2319_s22 = smov %s2310_s9 }
 0x966   :  { %1260 = vsyncpa [#allocation4], 1 }
 0x967   :  { %1262 = vsyncpa [#allocation4 + $0x1], 1 }
 0x968   :  { %1263 = vsyncpa [#allocation6], 1 }
 0x969   :  { %1265 = vsyncpa [#allocation6 + $0x1], 1 }

</bundles_post_ra>
